<compile_context>
chip_gen: v7x
topology: tpu7x:2x2x1
jax: 0.10.0
libtpu: 0.0.40
codegen_flags: <defaults>
</compile_context>

<pallas_src>
import functools

import jax
import jax.numpy as jnp
import numpy as np
from jax import lax
from jax.experimental import pallas as pl
from jax.experimental.pallas import tpu as pltpu


# ---------------------------------------------------------------------------
# Fused kernel: one image (grid step) per invocation.
# ---------------------------------------------------------------------------
def _fused_residual_kernel(x_ref, wb1_ref, b1_ref, wb2_ref, b2_ref, out_ref,
                           xp_ref, yp_ref, *, H, W, C):
    """x_ref/out_ref: (1, H, W*C); wb*: (3, (W+2)*C, W*C); b*: (1, W*C).

    xp_ref / yp_ref: (H+2, (W+2)*C) f32 VMEM scratch holding the reflect-
    padded input / intermediate activation.
    """
    WC = W * C

    def fill_padded(dst_ref, val):
        # ReflectionPad2d(1) built in VMEM: interior + edge copies.
        dst_ref[1:H + 1, C:C + WC] = val                              # interior
        dst_ref[1:H + 1, 0:C] = val[:, C:2 * C]                       # left  = col 1
        dst_ref[1:H + 1, C + WC:C + WC + C] = val[:, (W - 2) * C:(W - 1) * C]  # right = col W-2
        # Row reflection last so corners pick up the column-reflected values.
        dst_ref[0:1, :] = dst_ref[2:3, :]                             # top    = row 1
        dst_ref[H + 1:H + 2, :] = dst_ref[H - 1:H, :]                 # bottom = row H-2

    def conv3x3(src_ref, wb_ref, b_ref):
        # 3 matmuls (one per kernel row) against band-packed weights.
        acc = jnp.zeros((H, WC), jnp.float32)
        for dy in range(3):
            acc = acc + jnp.dot(src_ref[dy:dy + H, :], wb_ref[dy],
                                preferred_element_type=jnp.float32)
        return acc + b_ref[...]          # (1, WC) bias row broadcasts over H

    x = x_ref[0].astype(jnp.float32)     # (H, W*C)

    # conv1 + ReLU (result stays in VMEM/vregs)
    fill_padded(xp_ref, x)
    y1 = jnp.maximum(conv3x3(xp_ref, wb1_ref, b1_ref), 0.0)

    # conv2 + residual add
    fill_padded(yp_ref, y1)
    y2 = conv3x3(yp_ref, wb2_ref, b2_ref)

    out_ref[0] = (x + y2).astype(out_ref.dtype)


# ---------------------------------------------------------------------------
# Host-side weight / bias packing (pure jnp -> jit-safe).
# ---------------------------------------------------------------------------
def _band_weights(w_hwio, W):
    """(3,3,Cin,Cout) HWIO -> (3, (W+2)*Cin, W*Cout) banded matrices.

    wb[dy, (w+dx)*Cin + ci, w*Cout + co] = w_hwio[dy, dx, ci, co]
    so that  out_row = sum_dy  xpad[dy:dy+H, :] @ wb[dy]  is the 3x3 conv.
    """
    kh, kw, Cin, Cout = w_hwio.shape
    row = np.arange(W + 2)[:, None]
    col = np.arange(W)[None, :]
    # P[dx, r, w] = 1  iff  r == w + dx
    P = np.stack([(row == col + dx) for dx in range(kw)]).astype(np.float32)
    P = jnp.asarray(P)                                        # (kw, W+2, W)
    wb = jnp.einsum("drw,kdio->kriwo", P,
                    jnp.asarray(w_hwio, jnp.float32))         # (kh, W+2, Cin, W, Cout)
    return wb.reshape(kh, (W + 2) * Cin, W * Cout)


def _tile_bias(b, W):
    return jnp.tile(jnp.asarray(b, jnp.float32), W)[None, :]  # (1, W*C)


# ---------------------------------------------------------------------------
# Wrapper
# ---------------------------------------------------------------------------
def residual_block(x, w1, b1, w2, b2):
    """x: (N, H, W, C) f32 (NHWC); w*: (3, 3, C, C) HWIO; b*: (C,)."""
    N, H, W, C = x.shape
    WC = W * C
    KPC = (W + 2) * C

    x2d = x.reshape(N, H, WC)                 # lane-dense layout (free reshape)
    wb1 = _band_weights(w1, W)
    wb2 = _band_weights(w2, W)
    b1r = _tile_bias(b1, W)
    b2r = _tile_bias(b2, W)

    kernel = functools.partial(_fused_residual_kernel, H=H, W=W, C=C)

    out2d = pl.pallas_call(
        kernel,
        out_shape=jax.ShapeDtypeStruct((N, H, WC), x.dtype),
        grid=(N,),
        in_specs=[
            pl.BlockSpec((1, H, WC), lambda n: (n, 0, 0)),       # x
            pl.BlockSpec((3, KPC, WC), lambda n: (0, 0, 0)),     # banded w1
            pl.BlockSpec((1, WC), lambda n: (0, 0)),             # bias1 row
            pl.BlockSpec((3, KPC, WC), lambda n: (0, 0, 0)),     # banded w2
            pl.BlockSpec((1, WC), lambda n: (0, 0)),             # bias2 row
        ],
        out_specs=pl.BlockSpec((1, H, WC), lambda n: (n, 0, 0)),
        scratch_shapes=[
            pltpu.VMEM((H + 2, KPC), jnp.float32),   # reflect-padded x
            pltpu.VMEM((H + 2, KPC), jnp.float32),   # reflect-padded y1 (never hits HBM)
        ],
        compiler_params=pltpu.CompilerParams(
            dimension_semantics=("parallel",)),
    )(x2d, wb1, b1r, wb2, b2r)

    return out2d.reshape(N, H, W, C)


# ---------------------------------------------------------------------------
# Pure-JAX reference (same NHWC / HWIO convention) for verification.
# ---------------------------------------------------------------------------
def _reflect_pad1_nhwc(x):
    return jnp.pad(x, ((0, 0), (1, 1), (1, 1), (0, 0)), mode="reflect")


def _reference(x, w1, b1, w2, b2):
    dn = ("NHWC", "HWIO", "NHWC")

    def conv(a, w, b):
        y = lax.conv_general_dilated(a, w, window_strides=(1, 1),
                                     padding="VALID", dimension_numbers=dn)
        return y + b

    y = jnp.maximum(conv(_reflect_pad1_nhwc(x), w1, b1), 0.0)
    return x + conv(_reflect_pad1_nhwc(y), w2, b2)


if __name__ == "__main__":
    N, C, H, W = 2, 4, 16, 16  # small shapes consistent with the module

    key = jax.random.PRNGKey(0)
    kx, kw1, kb1, kw2, kb2 = jax.random.split(key, 5)

    x = jax.random.normal(kx, (N, H, W, C), dtype=jnp.float32)
    # Conv2d-style init: weights (3,3,Cin,Cout) HWIO + biases.
    fan_in = C * 3 * 3
    bound = 1.0 / np.sqrt(fan_in)
    w1 = jax.random.uniform(kw1, (3, 3, C, C), jnp.float32, -bound, bound)
    b1 = jax.random.uniform(kb1, (C,), jnp.float32, -bound, bound)
    w2 = jax.random.uniform(kw2, (3, 3, C, C), jnp.float32, -bound, bound)
    b2 = jax.random.uniform(kb2, (C,), jnp.float32, -bound, bound)

    fwd = jax.jit(residual_block)
    out = jax.block_until_ready(fwd(x, w1, b1, w2, b2))
    ref = jax.block_until_ready(_reference(x, w1, b1, w2, b2))

    assert out.shape == (N, H, W, C) and out.dtype == jnp.float32
    np.testing.assert_allclose(np.asarray(out), np.asarray(ref),
                               rtol=1e-4, atol=1e-4)
    print("KERNEL_OK")
</pallas_src>

<mosaic_0001>
module attributes {stable_mosaic.version = 11 : i64} {
  func.func @_fused_residual_kernel(%arg0: i32, %arg1: memref<1x16x64xf32, #tpu.memory_space<vmem>>, %arg2: memref<3x72x64xf32, #tpu.memory_space<vmem>>, %arg3: memref<1x64xf32, #tpu.memory_space<vmem>>, %arg4: memref<3x72x64xf32, #tpu.memory_space<vmem>>, %arg5: memref<1x64xf32, #tpu.memory_space<vmem>>, %arg6: memref<1x16x64xf32, #tpu.memory_space<vmem>>, %arg7: memref<18x72xf32, #tpu.memory_space<vmem>>, %arg8: memref<18x72xf32, #tpu.memory_space<vmem>>) attributes {dimension_semantics = [#tpu.dimension_semantics<parallel>], iteration_bounds = array<i64: 2>, scalar_prefetch = 0 : i64, scratch_operands = 2 : i64, tpu.core_type = #tpu.core_type<tc>, window_params = [{transform_indices = @transform_0, window_bounds = array<i64: 1, 16, 64>}, {pipeline_mode = #tpu.pipeline_mode<synchronous>, transform_indices = @transform_1, window_bounds = array<i64: 3, 72, 64>}, {pipeline_mode = #tpu.pipeline_mode<synchronous>, transform_indices = @transform_2, window_bounds = array<i64: 1, 64>}, {pipeline_mode = #tpu.pipeline_mode<synchronous>, transform_indices = @transform_3, window_bounds = array<i64: 3, 72, 64>}, {pipeline_mode = #tpu.pipeline_mode<synchronous>, transform_indices = @transform_4, window_bounds = array<i64: 1, 64>}, {transform_indices = @transform_5, window_bounds = array<i64: 1, 16, 64>}]} {
    %c0 = arith.constant 0 : index
    %c0_0 = arith.constant 0 : index
    %c0_1 = arith.constant 0 : index
    %0 = vector.load %arg1[%c0, %c0_0, %c0_1] : memref<1x16x64xf32, #tpu.memory_space<vmem>>, vector<1x16x64xf32>
    %1 = vector.shape_cast %0 : vector<1x16x64xf32> to vector<16x64xf32>
    %c1 = arith.constant 1 : index
    %c4 = arith.constant 4 : index
    %2 = vector.load %arg7[%c1, %c4] : memref<18x72xf32, #tpu.memory_space<vmem>>, vector<16x64xf32>
    tpu.vector_store %arg7[%c1, %c4], %1 {strides = array<i32>} : memref<18x72xf32, #tpu.memory_space<vmem>>, vector<16x64xf32>,
    %3 = vector.extract_strided_slice %1 {offsets = [0, 4], sizes = [16, 4], strides = [1, 1]} : vector<16x64xf32> to vector<16x4xf32>
    %c1_2 = arith.constant 1 : index
    %c0_3 = arith.constant 0 : index
    %4 = vector.load %arg7[%c1_2, %c0_3] : memref<18x72xf32, #tpu.memory_space<vmem>>, vector<16x4xf32>
    tpu.vector_store %arg7[%c1_2, %c0_3], %3 {strides = array<i32>} : memref<18x72xf32, #tpu.memory_space<vmem>>, vector<16x4xf32>,
    %5 = vector.extract_strided_slice %1 {offsets = [0, 56], sizes = [16, 4], strides = [1, 1]} : vector<16x64xf32> to vector<16x4xf32>
    %c1_4 = arith.constant 1 : index
    %c68 = arith.constant 68 : index
    %6 = vector.load %arg7[%c1_4, %c68] : memref<18x72xf32, #tpu.memory_space<vmem>>, vector<16x4xf32>
    tpu.vector_store %arg7[%c1_4, %c68], %5 {strides = array<i32>} : memref<18x72xf32, #tpu.memory_space<vmem>>, vector<16x4xf32>,
    %c2 = arith.constant 2 : index
    %c0_5 = arith.constant 0 : index
    %7 = vector.load %arg7[%c2, %c0_5] : memref<18x72xf32, #tpu.memory_space<vmem>>, vector<1x72xf32>
    %c0_6 = arith.constant 0 : index
    %c0_7 = arith.constant 0 : index
    %8 = vector.load %arg7[%c0_6, %c0_7] : memref<18x72xf32, #tpu.memory_space<vmem>>, vector<1x72xf32>
    tpu.vector_store %arg7[%c0_6, %c0_7], %7 {strides = array<i32>} : memref<18x72xf32, #tpu.memory_space<vmem>>, vector<1x72xf32>,
    %c15 = arith.constant 15 : index
    %c0_8 = arith.constant 0 : index
    %9 = vector.load %arg7[%c15, %c0_8] : memref<18x72xf32, #tpu.memory_space<vmem>>, vector<1x72xf32>
    %c17 = arith.constant 17 : index
    %c0_9 = arith.constant 0 : index
    %10 = vector.load %arg7[%c17, %c0_9] : memref<18x72xf32, #tpu.memory_space<vmem>>, vector<1x72xf32>
    tpu.vector_store %arg7[%c17, %c0_9], %9 {strides = array<i32>} : memref<18x72xf32, #tpu.memory_space<vmem>>, vector<1x72xf32>,
    %cst = arith.constant 0.000000e+00 : f32
    %11 = vector.broadcast %cst : f32 to vector<16x64xf32>
    %c0_10 = arith.constant 0 : index
    %c0_11 = arith.constant 0 : index
    %12 = vector.load %arg7[%c0_10, %c0_11] : memref<18x72xf32, #tpu.memory_space<vmem>>, vector<16x72xf32>
    %c0_12 = arith.constant 0 : index
    %c0_13 = arith.constant 0 : index
    %c0_14 = arith.constant 0 : index
    %13 = vector.load %arg2[%c0_12, %c0_13, %c0_14] : memref<3x72x64xf32, #tpu.memory_space<vmem>>, vector<1x72x64xf32>
    %14 = vector.shape_cast %13 : vector<1x72x64xf32> to vector<72x64xf32>
    %cst_15 = arith.constant dense<0.000000e+00> : vector<16x64xf32>
    %15 = tpu.matmul %12, %14, %cst_15 {dimension_numbers = #tpu.dot_dimension_numbers<[1], [0], [0], [1], [0, 0, 1, 1], [], []>} : vector<16x72xf32>, vector<72x64xf32>, vector<16x64xf32> -> vector<16x64xf32>
    %16 = arith.addf %11, %15 : vector<16x64xf32>
    %c1_16 = arith.constant 1 : index
    %c0_17 = arith.constant 0 : index
    %17 = vector.load %arg7[%c1_16, %c0_17] : memref<18x72xf32, #tpu.memory_space<vmem>>, vector<16x72xf32>
    %c1_18 = arith.constant 1 : index
    %c0_19 = arith.constant 0 : index
    %c0_20 = arith.constant 0 : index
    %18 = vector.load %arg2[%c1_18, %c0_19, %c0_20] : memref<3x72x64xf32, #tpu.memory_space<vmem>>, vector<1x72x64xf32>
    %19 = vector.shape_cast %18 : vector<1x72x64xf32> to vector<72x64xf32>
    %cst_21 = arith.constant dense<0.000000e+00> : vector<16x64xf32>
    %20 = tpu.matmul %17, %19, %cst_21 {dimension_numbers = #tpu.dot_dimension_numbers<[1], [0], [0], [1], [0, 0, 1, 1], [], []>} : vector<16x72xf32>, vector<72x64xf32>, vector<16x64xf32> -> vector<16x64xf32>
    %21 = arith.addf %16, %20 : vector<16x64xf32>
    %c2_22 = arith.constant 2 : index
    %c0_23 = arith.constant 0 : index
    %22 = vector.load %arg7[%c2_22, %c0_23] : memref<18x72xf32, #tpu.memory_space<vmem>>, vector<16x72xf32>
    %c2_24 = arith.constant 2 : index
    %c0_25 = arith.constant 0 : index
    %c0_26 = arith.constant 0 : index
    %23 = vector.load %arg2[%c2_24, %c0_25, %c0_26] : memref<3x72x64xf32, #tpu.memory_space<vmem>>, vector<1x72x64xf32>
    %24 = vector.shape_cast %23 : vector<1x72x64xf32> to vector<72x64xf32>
    %cst_27 = arith.constant dense<0.000000e+00> : vector<16x64xf32>
    %25 = tpu.matmul %22, %24, %cst_27 {dimension_numbers = #tpu.dot_dimension_numbers<[1], [0], [0], [1], [0, 0, 1, 1], [], []>} : vector<16x72xf32>, vector<72x64xf32>, vector<16x64xf32> -> vector<16x64xf32>
    %26 = arith.addf %21, %25 : vector<16x64xf32>
    %c0_28 = arith.constant 0 : index
    %c0_29 = arith.constant 0 : index
    %27 = vector.load %arg3[%c0_28, %c0_29] : memref<1x64xf32, #tpu.memory_space<vmem>>, vector<1x64xf32>
    %28 = vector.broadcast %27 : vector<1x64xf32> to vector<16x64xf32>
    %29 = arith.addf %26, %28 : vector<16x64xf32>
    %cst_30 = arith.constant 0.000000e+00 : f32
    %30 = vector.broadcast %cst_30 : f32 to vector<16x64xf32>
    %31 = arith.maximumf %29, %30 : vector<16x64xf32>
    %c1_31 = arith.constant 1 : index
    %c4_32 = arith.constant 4 : index
    %32 = vector.load %arg8[%c1_31, %c4_32] : memref<18x72xf32, #tpu.memory_space<vmem>>, vector<16x64xf32>
    tpu.vector_store %arg8[%c1_31, %c4_32], %31 {strides = array<i32>} : memref<18x72xf32, #tpu.memory_space<vmem>>, vector<16x64xf32>,
    %33 = vector.extract_strided_slice %31 {offsets = [0, 4], sizes = [16, 4], strides = [1, 1]} : vector<16x64xf32> to vector<16x4xf32>
    %c1_33 = arith.constant 1 : index
    %c0_34 = arith.constant 0 : index
    %34 = vector.load %arg8[%c1_33, %c0_34] : memref<18x72xf32, #tpu.memory_space<vmem>>, vector<16x4xf32>
    tpu.vector_store %arg8[%c1_33, %c0_34], %33 {strides = array<i32>} : memref<18x72xf32, #tpu.memory_space<vmem>>, vector<16x4xf32>,
    %35 = vector.extract_strided_slice %31 {offsets = [0, 56], sizes = [16, 4], strides = [1, 1]} : vector<16x64xf32> to vector<16x4xf32>
    %c1_35 = arith.constant 1 : index
    %c68_36 = arith.constant 68 : index
    %36 = vector.load %arg8[%c1_35, %c68_36] : memref<18x72xf32, #tpu.memory_space<vmem>>, vector<16x4xf32>
    tpu.vector_store %arg8[%c1_35, %c68_36], %35 {strides = array<i32>} : memref<18x72xf32, #tpu.memory_space<vmem>>, vector<16x4xf32>,
    %c2_37 = arith.constant 2 : index
    %c0_38 = arith.constant 0 : index
    %37 = vector.load %arg8[%c2_37, %c0_38] : memref<18x72xf32, #tpu.memory_space<vmem>>, vector<1x72xf32>
    %c0_39 = arith.constant 0 : index
    %c0_40 = arith.constant 0 : index
    %38 = vector.load %arg8[%c0_39, %c0_40] : memref<18x72xf32, #tpu.memory_space<vmem>>, vector<1x72xf32>
    tpu.vector_store %arg8[%c0_39, %c0_40], %37 {strides = array<i32>} : memref<18x72xf32, #tpu.memory_space<vmem>>, vector<1x72xf32>,
    %c15_41 = arith.constant 15 : index
    %c0_42 = arith.constant 0 : index
    %39 = vector.load %arg8[%c15_41, %c0_42] : memref<18x72xf32, #tpu.memory_space<vmem>>, vector<1x72xf32>
    %c17_43 = arith.constant 17 : index
    %c0_44 = arith.constant 0 : index
    %40 = vector.load %arg8[%c17_43, %c0_44] : memref<18x72xf32, #tpu.memory_space<vmem>>, vector<1x72xf32>
    tpu.vector_store %arg8[%c17_43, %c0_44], %39 {strides = array<i32>} : memref<18x72xf32, #tpu.memory_space<vmem>>, vector<1x72xf32>,
    %cst_45 = arith.constant 0.000000e+00 : f32
    %41 = vector.broadcast %cst_45 : f32 to vector<16x64xf32>
    %c0_46 = arith.constant 0 : index
    %c0_47 = arith.constant 0 : index
    %42 = vector.load %arg8[%c0_46, %c0_47] : memref<18x72xf32, #tpu.memory_space<vmem>>, vector<16x72xf32>
    %c0_48 = arith.constant 0 : index
    %c0_49 = arith.constant 0 : index
    %c0_50 = arith.constant 0 : index
    %43 = vector.load %arg4[%c0_48, %c0_49, %c0_50] : memref<3x72x64xf32, #tpu.memory_space<vmem>>, vector<1x72x64xf32>
    %44 = vector.shape_cast %43 : vector<1x72x64xf32> to vector<72x64xf32>
    %cst_51 = arith.constant dense<0.000000e+00> : vector<16x64xf32>
    %45 = tpu.matmul %42, %44, %cst_51 {dimension_numbers = #tpu.dot_dimension_numbers<[1], [0], [0], [1], [0, 0, 1, 1], [], []>} : vector<16x72xf32>, vector<72x64xf32>, vector<16x64xf32> -> vector<16x64xf32>
    %46 = arith.addf %41, %45 : vector<16x64xf32>
    %c1_52 = arith.constant 1 : index
    %c0_53 = arith.constant 0 : index
    %47 = vector.load %arg8[%c1_52, %c0_53] : memref<18x72xf32, #tpu.memory_space<vmem>>, vector<16x72xf32>
    %c1_54 = arith.constant 1 : index
    %c0_55 = arith.constant 0 : index
    %c0_56 = arith.constant 0 : index
    %48 = vector.load %arg4[%c1_54, %c0_55, %c0_56] : memref<3x72x64xf32, #tpu.memory_space<vmem>>, vector<1x72x64xf32>
    %49 = vector.shape_cast %48 : vector<1x72x64xf32> to vector<72x64xf32>
    %cst_57 = arith.constant dense<0.000000e+00> : vector<16x64xf32>
    %50 = tpu.matmul %47, %49, %cst_57 {dimension_numbers = #tpu.dot_dimension_numbers<[1], [0], [0], [1], [0, 0, 1, 1], [], []>} : vector<16x72xf32>, vector<72x64xf32>, vector<16x64xf32> -> vector<16x64xf32>
    %51 = arith.addf %46, %50 : vector<16x64xf32>
    %c2_58 = arith.constant 2 : index
    %c0_59 = arith.constant 0 : index
    %52 = vector.load %arg8[%c2_58, %c0_59] : memref<18x72xf32, #tpu.memory_space<vmem>>, vector<16x72xf32>
    %c2_60 = arith.constant 2 : index
    %c0_61 = arith.constant 0 : index
    %c0_62 = arith.constant 0 : index
    %53 = vector.load %arg4[%c2_60, %c0_61, %c0_62] : memref<3x72x64xf32, #tpu.memory_space<vmem>>, vector<1x72x64xf32>
    %54 = vector.shape_cast %53 : vector<1x72x64xf32> to vector<72x64xf32>
    %cst_63 = arith.constant dense<0.000000e+00> : vector<16x64xf32>
    %55 = tpu.matmul %52, %54, %cst_63 {dimension_numbers = #tpu.dot_dimension_numbers<[1], [0], [0], [1], [0, 0, 1, 1], [], []>} : vector<16x72xf32>, vector<72x64xf32>, vector<16x64xf32> -> vector<16x64xf32>
    %56 = arith.addf %51, %55 : vector<16x64xf32>
    %c0_64 = arith.constant 0 : index
    %c0_65 = arith.constant 0 : index
    %57 = vector.load %arg5[%c0_64, %c0_65] : memref<1x64xf32, #tpu.memory_space<vmem>>, vector<1x64xf32>
    %58 = vector.broadcast %57 : vector<1x64xf32> to vector<16x64xf32>
    %59 = arith.addf %56, %58 : vector<16x64xf32>
    %60 = arith.addf %1, %59 : vector<16x64xf32>
    %c0_66 = arith.constant 0 : index
    %c0_67 = arith.constant 0 : index
    %c0_68 = arith.constant 0 : index
    %61 = vector.load %arg6[%c0_66, %c0_67, %c0_68] : memref<1x16x64xf32, #tpu.memory_space<vmem>>, vector<1x16x64xf32>
    %62 = vector.shape_cast %61 : vector<1x16x64xf32> to vector<16x64xf32>
    %63 = vector.shape_cast %60 : vector<16x64xf32> to vector<1x16x64xf32>
    tpu.vector_store %arg6[%c0_66, %c0_67, %c0_68], %63 {strides = array<i32>} : memref<1x16x64xf32, #tpu.memory_space<vmem>>, vector<1x16x64xf32>,
    return
  }
  func.func @transform_0(%arg0: i32) -> (i32, i32, i32) {
    %c0_i32 = arith.constant 0 : i32
    %c0_i32_0 = arith.constant 0 : i32
    %c0_i32_1 = arith.constant 0 : i32
    return %arg0, %c0_i32, %c0_i32_0 : i32, i32, i32
  }
  func.func @transform_1(%arg0: i32) -> (i32, i32, i32) {
    %c0_i32 = arith.constant 0 : i32
    %c0_i32_0 = arith.constant 0 : i32
    %c0_i32_1 = arith.constant 0 : i32
    %c0_i32_2 = arith.constant 0 : i32
    return %c0_i32, %c0_i32_0, %c0_i32_1 : i32, i32, i32
  }
  func.func @transform_2(%arg0: i32) -> (i32, i32) {
    %c0_i32 = arith.constant 0 : i32
    %c0_i32_0 = arith.constant 0 : i32
    %c0_i32_1 = arith.constant 0 : i32
    return %c0_i32, %c0_i32_0 : i32, i32
  }
  func.func @transform_3(%arg0: i32) -> (i32, i32, i32) {
    %c0_i32 = arith.constant 0 : i32
    %c0_i32_0 = arith.constant 0 : i32
    %c0_i32_1 = arith.constant 0 : i32
    %c0_i32_2 = arith.constant 0 : i32
    return %c0_i32, %c0_i32_0, %c0_i32_1 : i32, i32, i32
  }
  func.func @transform_4(%arg0: i32) -> (i32, i32) {
    %c0_i32 = arith.constant 0 : i32
    %c0_i32_0 = arith.constant 0 : i32
    %c0_i32_1 = arith.constant 0 : i32
    return %c0_i32, %c0_i32_0 : i32, i32
  }
  func.func @transform_5(%arg0: i32) -> (i32, i32, i32) {
    %c0_i32 = arith.constant 0 : i32
    %c0_i32_0 = arith.constant 0 : i32
    %c0_i32_1 = arith.constant 0 : i32
    return %arg0, %c0_i32, %c0_i32_0 : i32, i32, i32
  }
}

</mosaic_0001>

<bundles_post_ra>
// kernel: tile.13
= control target key start
LH: loop header
LB: loop body
LE: loop exit
PB: predicated region body
PF: predicated region fallthrough
CT: control target
= control target key end

     0   :  { %s28_s0 = inlined_call_operand.vmem [shape: f32[4], index: 0, kind: input, shape index: {}]   ;;  %s29_s1 = inlined_call_operand.vmem [shape: f32[16,4], index: 1, kind: output, shape index: {}]  }
   0x1   :  { %v4_v0 = vld [vmem:[%s28_s0] ss:$0 sm:$0xff] }
   0x2   :  { %5 = vst [vmem:[%s29_s1] sm:$0xff] %v4_v0  ;;  %8 = vst [vmem:[%s29_s1 + $0x8] sm:$0xff] %v4_v0 }

// kernel: tile.14
= control target key start
LH: loop header
LB: loop body
LE: loop exit
PB: predicated region body
PF: predicated region fallthrough
CT: control target
= control target key end

     0   :  { %s131_s10 = smov 60   ;;  %s132_s11 = smov 52   ;;  %vm3_vm0 = vcmask 31744   ;;  %vm9_vm1 = vcmask 523744   ;;  %vm15_vm2 = vcmask 490944   ;;  %vm21_vm3 = vcmask 458144   ;;  %s207_s0 = inlined_call_operand.vmem [shape: f32[16,4], index: 0, kind: input, shape index: {}]   ;;  %s208_s1 = inlined_call_operand.vmem [shape: f32[1,64], index: 1, kind: output, shape index: {}]  }
   0x1   :  { %v101_v0 = vld [vmem:[%s207_s0 + $0xf] sm:$0x1]   ;;  %v103_v1 = vld [vmem:[%s207_s0 + $0xd] sm:$0x1]   ;;  %v102_v2 = vld [vmem:[%s207_s0 + $0xe] sm:$0x1]  }
   0x2   :  { %7 = vrot.lane.b32.xlu0 %v101_v0, %s131_s10  ;;  %19 = vrot.lane.b32.xlu1 %v103_v1, %s132_s11  ;;  %v104_v3 = vld [vmem:[%s207_s0 + $0xc] sm:$0x1]   ;;  %s133_s16 = smov 56   ;;  %s134_s17 = smov 48   ;;  %v105_v4 = vld [vmem:[%s207_s0 + $0xb] sm:$0x1]  }
   0x3   :  { %v106_v5 = vld [vmem:[%s207_s0 + $0xa] sm:$0x1]   ;;  %v2_v6 = vld [vmem:[%s207_s0] sm:$0x1]   ;;  %s135_s24 = smov 44   ;;  %s136_s25 = smov 40  }
   0x4   :  { %4 = vst.msk [vmem:[#allocation0] sm:$0x1] %vm3_vm0, %v2_v6   ;;  %v107_v7 = vld [vmem:[%s207_s0 + $0x9] sm:$0x1]   ;;  %v108_v8 = vld [vmem:[%s207_s0 + $0x8] sm:$0x1]  }
   0x5   :  { %s137_s30 = smov 36   ;;  %s138_s2 = smov 32   ;;  %v109_v9 = vld [vmem:[%s207_s0 + $0x7] sm:$0x1]   ;;  %v110_v10 = vld [vmem:[%s207_s0 + $0x6] sm:$0x1]  }
   0x6   :  { %13 = vrot.lane.b32.xlu0 %v102_v2, %s133_s16  ;;  %25 = vrot.lane.b32.xlu1 %v104_v3, %s134_s17  ;;  %s139_s7 = smov 28   ;;  %s140_s8 = smov 24   ;;  %v111_v11 = vld [vmem:[%s207_s0 + $0x5] sm:$0x1]   ;;  %v112_v12 = vld [vmem:[%s207_s0 + $0x4] sm:$0x1]  }
   0x7   :  { %s141_s13 = smov 20   ;;  %s142_s14 = smov 16   ;;  %v113_v13 = vld [vmem:[%s207_s0 + $0x3] sm:$0x1]   ;;  %v114_v14 = vld [vmem:[%s207_s0 + $0x2] sm:$0x1]  }
   0x8   :  { %s143_s19 = smov 12   ;;  %s144_s20 = smov 8   ;;  %v115_v15 = vld [vmem:[%s207_s0 + $0x1] sm:$0x1]   ;;  %vm27_vm4 = vcmask 425344   ;;  %vm33_vm5 = vcmask 392544  }
   0x9   :  { %s145_s0 = smov 4   ;;  %vm39_vm6 = vcmask 359744   ;;  %vm45_vm7 = vcmask 326944   ;;  %vm51_vm8 = vcmask 294144   ;;  %vm57_vm9 = vcmask 261344  }
   0xa   :  { %31 = vrot.lane.b32.xlu0 %v105_v4, %s135_s24  ;;  %37 = vrot.lane.b32.xlu1 %v106_v5, %s136_s25  ;;  %vm63_vm10 = vcmask 228544   ;;  %vm69_vm11 = vcmask 195744   ;;  %vm75_vm12 = vcmask 162944   ;;  %vm81_vm13 = vcmask 130144  }
   0xb   :  { %vm87_vm14 = vcmask 97344   ;;  %vm93_vm15 = vcmask 64544  }
   0xe   :  { %43 = vrot.lane.b32.xlu0 %v107_v7, %s137_s30  ;;  %49 = vrot.lane.b32.xlu1 %v108_v8, %s138_s2 }
  0x12   :  { %55 = vrot.lane.b32.xlu0 %v109_v9, %s139_s7  ;;  %61 = vrot.lane.b32.xlu1 %v110_v10, %s140_s8 }
  0x16   :  { %67 = vrot.lane.b32.xlu0 %v111_v11, %s141_s13  ;;  %73 = vrot.lane.b32.xlu1 %v112_v12, %s142_s14 }
  0x1a   :  { %79 = vrot.lane.b32.xlu0 %v113_v13, %s143_s19  ;;  %85 = vrot.lane.b32.xlu1 %v114_v14, %s144_s20 }
  0x1e   :  { %91 = vrot.lane.b32.xlu0 %v115_v15, %s145_s0 }
  0x74   :  { %v8_v16 = vpop.permute.xlu0 %7   ;;  %v20_v17 = vpop.permute.xlu1 %19  }
  0x75   :  { %10 = vst.msk [vmem:[#allocation0] sm:$0x1] %vm9_vm1, %v8_v16  }
  0x78   :  { %v14_v18 = vpop.permute.xlu0 %13   ;;  %v26_v19 = vpop.permute.xlu1 %25  }
  0x79   :  { %16 = vst.msk [vmem:[#allocation0] sm:$0x1] %vm15_vm2, %v14_v18  }
  0x7a   :  { %22 = vst.msk [vmem:[#allocation0] sm:$0x1] %vm21_vm3, %v20_v17  }
  0x7b   :  { %28 = vst.msk [vmem:[#allocation0] sm:$0x1] %vm27_vm4, %v26_v19  }
  0x7c   :  { %v32_v20 = vpop.permute.xlu0 %31   ;;  %v38_v21 = vpop.permute.xlu1 %37  }
  0x7d   :  { %34 = vst.msk [vmem:[#allocation0] sm:$0x1] %vm33_vm5, %v32_v20  }
  0x7e   :  { %40 = vst.msk [vmem:[#allocation0] sm:$0x1] %vm39_vm6, %v38_v21  }
  0x80   :  { %v44_v22 = vpop.permute.xlu0 %43   ;;  %v50_v23 = vpop.permute.xlu1 %49  }
  0x81   :  { %46 = vst.msk [vmem:[#allocation0] sm:$0x1] %vm45_vm7, %v44_v22  }
  0x82   :  { %52 = vst.msk [vmem:[#allocation0] sm:$0x1] %vm51_vm8, %v50_v23  }
  0x84   :  { %v56_v24 = vpop.permute.xlu0 %55   ;;  %v62_v25 = vpop.permute.xlu1 %61  }
  0x85   :  { %58 = vst.msk [vmem:[#allocation0] sm:$0x1] %vm57_vm9, %v56_v24  }
  0x86   :  { %64 = vst.msk [vmem:[#allocation0] sm:$0x1] %vm63_vm10, %v62_v25  }
  0x88   :  { %v68_v26 = vpop.permute.xlu0 %67   ;;  %v74_v27 = vpop.permute.xlu1 %73  }
  0x89   :  { %70 = vst.msk [vmem:[#allocation0] sm:$0x1] %vm69_vm11, %v68_v26  }
  0x8a   :  { %76 = vst.msk [vmem:[#allocation0] sm:$0x1] %vm75_vm12, %v74_v27  }
  0x8c   :  { %v80_v28 = vpop.permute.xlu0 %79   ;;  %v86_v29 = vpop.permute.xlu1 %85  }
  0x8d   :  { %82 = vst.msk [vmem:[#allocation0] sm:$0x1] %vm81_vm13, %v80_v28  }
  0x8e   :  { %88 = vst.msk [vmem:[#allocation0] sm:$0x1] %vm87_vm14, %v86_v29  }
  0x90   :  { %v92_v30 = vpop.permute.xlu0 %91  }
  0x91   :  { %94 = vst.msk [vmem:[#allocation0] sm:$0x1] %vm93_vm15, %v92_v30  }
  0x98   :  { %v98_v31 = vld [vmem:[#allocation0] sm:$0x1] }
  0x99   :  { %100 = vst [vmem:[%s208_s1] sm:$0x1] %v98_v31 }

// kernel: residual_block.1
= control target key start
LH: loop header
LB: loop body
LE: loop exit
PB: predicated region body
PF: predicated region fallthrough
CT: control target
= control target key end

     0   :  { %s1343_s18 = smov 0   ;;  %s1587_s0 = inlined_call_operand.vmem [shape: f32[2,16,64], index: 0, kind: input, shape index: {}]   ;;  %s1588_s1 = inlined_call_operand.vmem [shape: f32[3,72,64], index: 1, kind: input, shape index: {}]   ;;  %s1589_s2 = inlined_call_operand.vmem [shape: f32[1,64], index: 2, kind: input, shape index: {}]   ;;  %s1590_s3 = inlined_call_operand.vmem [shape: f32[3,72,64], index: 3, kind: input, shape index: {}]   ;;  %s1591_s4 = inlined_call_operand.vmem [shape: f32[1,64], index: 4, kind: input, shape index: {}]   ;;  %s1592_s5 = inlined_call_operand.vmem [shape: f32[2,16,64], index: 5, kind: output, shape index: {}]  }
   0x1 LB: > { %s932_s19 = sadd.s32 4294967295, %s1308_s18   ;;  %p936_p0 = scmp.ge.s32.totalorder %s1308_s18, 1  ;;  %s1308_s18 = sphi %s1343_s18, %s15_s18  }
   0x2   : > { %p187_p1 = scmp.lt.s32.totalorder %s1308_s18, 3 }
   0x4   : > { %p188_p2 = pnand %p936_p0, %p187_p1 }
   0x5   : > { %p215_p3 = scmp.lt.s32.totalorder (!%p188_p2), %s932_s19, 1  ;;  %v941_v0 = vld [vmem:[%s1588_s1 + $0x48] sm:$0xff] (!%p188_p2)  ;;  %v942_v1 = vld [vmem:[%s1588_s1 + $0x50] sm:$0xff] (!%p188_p2)  ;;  %v943_v3 = vld [vmem:[%s1588_s1 + $0x58] sm:$0xff] (!%p188_p2)  ;;  %s1310_s15 = smov (!%p188_p2), 124   ;;  %vm235_vm0 = vcmask (!%p188_p2), 556064  }
   0x6   : > { %191 = sbr.rel (%p188_p2) target bundleno = 790 (0x316), region = 40  ;;  %v1187_v2 = vpack.c.bf16 (!%p188_p2), %v942_v1, %v941_v0  ;;  %v944_v4 = vld [vmem:[%s1588_s1 + $0x60] sm:$0xff] (!%p188_p2)  ;;  %v945_v6 = vld [vmem:[%s1588_s1 + $0x68] sm:$0xff] (!%p188_p2)  ;;  %v946_v7 = vld [vmem:[%s1588_s1 + $0x70] sm:$0xff] (!%p188_p2)  ;;  %s1311_s16 = smov (!%p188_p2), 4   ;;  %vm244_vm1 = vcmask (!%p188_p2), 31744  }
   0x7   : > { %v1191_v5 = vpack.c.bf16 (!%p188_p2), %v944_v4, %v943_v3  ;;  %v1195_v8 = vpack.c.bf16 (!%p188_p2), %v946_v7, %v945_v6  ;;  %v947_v10 = vld [vmem:[%s1588_s1 + $0x78] sm:$0xff] (!%p188_p2)  ;;  %v948_v11 = vld [vmem:[%s1588_s1 + $0x80] sm:$0xff] (!%p188_p2)  ;;  %v949_v14 = vld [vmem:[%s1588_s1 + $0x88] sm:$0xff] (!%p188_p2)  ;;  %s1312_s25 = smov (!%p188_p2), 12   ;;  %vm253_vm2 = vcmask (!%p188_p2), 589344   ;;  %vm257_vm3 = vcmask (!%p188_p2), 581632  }
   0x8   : > { %1188 = vmatprep.subr.bf16.mxu0 (!%p188_p2), %v1187_v2  ;;  %v1199_v13 = vpack.c.bf16 (!%p188_p2), %v948_v11, %v947_v10  ;;  %v263_v15 = vld [vmem:[%s1588_s1] sm:$0xff] (!%p188_p2)  ;;  %v264_v16 = vld [vmem:[%s1588_s1 + $0x8] sm:$0xff] (!%p188_p2)  ;;  %v265_v24 = vld [vmem:[%s1588_s1 + $0x10] sm:$0xff] (!%p188_p2)  ;;  %vm284_vm4 = vcmask (!%p188_p2), 588800   ;;  %vm874_vm5 = vcmask (!%p188_p2), 523264  }
   0x9   : > { %1190 = vmatpush3.bf16.msra.mxu0 (!%p188_p2), %v1187_v2  ;;  %v1203_v17 = vpack.c.bf16 (!%p188_p2), %v264_v16, %v263_v15  ;;  %v266_v25 = vld [vmem:[%s1588_s1 + $0x18] sm:$0xff] (!%p188_p2)  ;;  %v267_v31 = vld [vmem:[%s1588_s1 + $0x20] sm:$0xff] (!%p188_p2)  ;;  %v268_v32 = vld [vmem:[%s1588_s1 + $0x28] sm:$0xff] (!%p188_p2) }
   0xa   : > { %1192 = vmatprep.subr.bf16.mxu0 (!%p188_p2), %v1191_v5  ;;  %v1207_v29 = vpack.c.bf16 (!%p188_p2), %v266_v25, %v265_v24  ;;  %v1211_v33 = vpack.c.bf16 (!%p188_p2), %v268_v32, %v267_v31  ;;  %v269_v34 = vld [vmem:[%s1588_s1 + $0x30] sm:$0xff] (!%p188_p2)  ;;  %v270_v35 = vld [vmem:[%s1588_s1 + $0x38] sm:$0xff] (!%p188_p2)  ;;  %v271_v38 = vld [vmem:[%s1588_s1 + $0x40] sm:$0xff] (!%p188_p2) }
   0xb   : > { %v1215_v37 = vpack.c.bf16 (!%p188_p2), %v270_v35, %v269_v34  ;;  %v954_v39 = vld [vmem:[%s1588_s1 + $0x90] sm:$0xff] (!%p188_p2)  ;;  %v955_v40 = vld [vmem:[%s1588_s1 + $0x98] sm:$0xff] (!%p188_p2)  ;;  %v956_v41 = vld [vmem:[%s1588_s1 + $0xa0] sm:$0xff] (!%p188_p2) }
   0xc   : > { %v957_v42 = vld [vmem:[%s1588_s1 + $0xa8] sm:$0xff] (!%p188_p2)  ;;  %v1219_v43 = vpack.c.bf16 (!%p188_p2), %v955_v40, %v954_v39  ;;  %v958_v46 = vld [vmem:[%s1588_s1 + $0xb0] sm:$0xff] (!%p188_p2)  ;;  %v959_v47 = vld [vmem:[%s1588_s1 + $0xb8] sm:$0xff] (!%p188_p2) }
   0xd   : > { %s1594_s19 = smov (!%p215_p3, %s932_s19), 1  ;;  %1194 = vmatpush3.bf16.msra.mxu0 %v1191_v5  ;;  %v1223_v44 = vpack.c.bf16 %v957_v42, %v956_v41  ;;  %v1227_v49 = vpack.c.bf16 %v959_v47, %v958_v46  ;;  %v960_v50 = vld [vmem:[%s1588_s1 + $0xc0] sm:$0xff]  ;;  %v961_v51 = vld [vmem:[%s1588_s1 + $0xc8] sm:$0xff]  ;;  %v962_v53 = vld [vmem:[%s1588_s1 + $0xd0] sm:$0xff] }
   0xe   : > { %s993_s7 = sshll.u32 %s1594_s19, 4  ;;  %1196 = vmatprep.subr.bf16.mxu0 %v1195_v8  ;;  %v1231_v52 = vpack.c.bf16 %v961_v51, %v960_v50  ;;  %v966_v55 = vld [vmem:[%s1590_s3 + $0x48] sm:$0xff]  ;;  %v967_v56 = vld [vmem:[%s1590_s3 + $0x50] sm:$0xff]  ;;  %v968_v58 = vld [vmem:[%s1590_s3 + $0x58] sm:$0xff] }
   0xf   : > { %s219_s10 = scalar_lea.vmem %s1587_s0, %s993_s7  ;;  %v1235_v57 = vpack.c.bf16 %v967_v56, %v966_v55  ;;  %v969_v59 = vld [vmem:[%s1590_s3 + $0x60] sm:$0xff]  ;;  %v970_v61 = vld [vmem:[%s1590_s3 + $0x68] sm:$0xff]  ;;  %v971_v62 = vld [vmem:[%s1590_s3 + $0x70] sm:$0xff]  ;;  %s224_s12 = scalar_lea.vmem %s1592_s5, %s993_s7 }
  0x10   : > { %v1377_v9 = vld [vmem:[%s219_s10] sm:$0xff]  ;;  %v1389_v12 = vld [vmem:[%s219_s10 + $0x8] sm:$0xff]  ;;  %v1239_v60 = vpack.c.bf16 %v969_v59, %v968_v58  ;;  %v1243_v63 = vpack.c.bf16 %v971_v62, %v970_v61  ;;  %v972_v2 = vld [vmem:[%s1590_s3 + $0x78] sm:$0xff] }
  0x11   : > { %238 = vrot.lane.b32.xlu1 %v1377_v9, %s1310_s15  ;;  %229 = vrot.lane.b32.xlu0 %v1377_v9, %s1311_s16  ;;  %v965_v0 = vld [vmem:[%s1589_s2] ss:$0 sm:$0xff]  ;;  %v974_v11 = vld [vmem:[%s1590_s3 + $0x88] sm:$0xff] }
  0x12   : > { %1198 = vmatpush3.bf16.msra.mxu0 %v1195_v8  ;;  %1236 = vmatprep.subr.bf16.mxu1 %v1235_v57  ;;  %v973_v3 = vld [vmem:[%s1590_s3 + $0x80] sm:$0xff]  ;;  %v591_v32 = vld [vmem:[%s1590_s3 + $0x30] sm:$0xff]  ;;  %v982_v40 = vld [vmem:[%s1590_s3 + $0xa8] sm:$0xff] }
  0x13   : > { %1200 = vmatprep.subr.bf16.mxu0 %v1199_v13  ;;  %1238 = vmatpush3.bf16.msra.mxu1 %v1235_v57  ;;  %v1247_v6 = vpack.c.bf16 %v973_v3, %v972_v2  ;;  %v981_v39 = vld [vmem:[%s1590_s3 + $0xa0] sm:$0xff]  ;;  %v987_v51 = vld [vmem:[%s1590_s3 + $0xd0] sm:$0xff] }
  0x14   : > { %1240 = vmatprep.subr.bf16.mxu1 %v1239_v60  ;;  %v1271_v42 = vpack.c.bf16 %v982_v40, %v981_v39 }
  0x15   : > { %240 = vrot.lane.b32.xlu1 %v1389_v12, %s1310_s15  ;;  %231 = vrot.lane.b32.xlu0 %v1389_v12, %s1311_s16 }
  0x16   : > { %1202 = vmatpush3.bf16.msra.mxu0 %v1199_v13  ;;  %v585_v13 = vld [vmem:[%s1590_s3] sm:$0xff] }
  0x17   : > { %1077 = vmatprep.subr.mxu0 %v949_v14  ;;  %1242 = vmatpush3.bf16.msra.mxu1 %v1239_v60 }
  0x18   : > { %1244 = vmatprep.subr.bf16.mxu1 %v1243_v63 }
  0x19   : > { %249 = vrot.lane.b32.xlu1 %v1389_v12, %s1312_s25  ;;  %247 = vrot.lane.b32.xlu0 %v1377_v9, %s1312_s25 }
  0x1a   : > { %1078 = vmatpush3.msra.mxu0 %v949_v14  ;;  %v586_v14 = vld [vmem:[%s1590_s3 + $0x8] sm:$0xff] }
  0x1b   : > { %1204 = vmatprep.subr.bf16.mxu0 %v1203_v17  ;;  %1246 = vmatpush3.bf16.msra.mxu1 %v1243_v63  ;;  %v1251_v15 = vpack.c.bf16 %v586_v14, %v585_v13 }
  0x1c   : > { %1248 = vmatprep.subr.bf16.mxu1 %v1247_v6 }
  0x1f   : > { %1250 = vmatpush3.bf16.msra.mxu1 %v1247_v6 }
  0x20   : > { %1140 = vmatprep.subr.mxu1 %v974_v11 }
  0x23   : > { %1141 = vmatpush3.msra.mxu1 %v974_v11 }
  0x24   : > { %1252 = vmatprep.subr.bf16.mxu1 %v1251_v15 }
  0x83   : > { %v239_v18 = vpop.permute.xlu1 %238  ;;  %v230_v19 = vpop.permute.xlu0 %229 }
  0x84   : > { %236 = vst.msk [vmem:[#allocation2 + $0x1] sm:$0xff] %vm235_vm0, %v230_v19 }
  0x85   : > { %245 = vst.msk [vmem:[#allocation2 + $0x1] sm:$0xff] %vm244_vm1, %v239_v18 }
  0x87   : > { %v241_v20 = vpop.permute.xlu1 %240  ;;  %v232_v21 = vpop.permute.xlu0 %231 }
  0x88   : > { %237 = vst.msk [vmem:[#allocation2 + $0x9] sm:$0xff] %vm235_vm0, %v232_v21 }
  0x89   : > { %246 = vst.msk [vmem:[#allocation2 + $0x9] sm:$0xff] %vm244_vm1, %v241_v20 }
  0x8b   : > { %v250_v22 = vpop.permute.xlu1 %249  ;;  %v248_v23 = vpop.permute.xlu0 %247 }
  0x8c   : > { %255 = vst.msk [vmem:[#allocation2 + $0x9] sm:$0xff] %vm253_vm2, %v250_v22  ;;  %254 = vst.msk [vmem:[#allocation2 + $0x1] sm:$0xff] %vm253_vm2, %v248_v23  ;;  %v587_v22 = vld [vmem:[%s1590_s3 + $0x10] sm:$0xff]  ;;  %v588_v23 = vld [vmem:[%s1590_s3 + $0x18] sm:$0xff] }
  0x93   : > { %v259_v26 = vld [vmem:[#allocation2 + $0xf] sm:$0x1]  ;;  %v256_v27 = vld [vmem:[#allocation2 + $0x2] sm:$0x1] }
  0x94   : > { %v272_v28 = vld [vmem:[#allocation2 + $0x1] sm:$0xff]  ;;  %260 = vst.msk [vmem:[#allocation2 + $0x11] sm:$0x1] %vm257_vm3, %v259_v26  ;;  %258 = vst.msk [vmem:[#allocation2] sm:$0x1] %vm257_vm3, %v256_v27  ;;  %v273_v30 = vld [vmem:[#allocation2 + $0x9] sm:$0xff]  ;;  %v1255_v27 = vpack.c.bf16 %v588_v23, %v587_v22 }
  0x95   : > { %1079 = vmatprep.mubr.msk.f32.mxu0 %vm284_vm4, %v272_v28  ;;  %v262_v45 = vld [vmem:[#allocation2 + $0x8] sm:$0xff] }
  0x96   : > { %1080 = vmatmul.mubr.msk.f32.vlgmr.msra.gmra.mrb[0].mxu0 %vm284_vm4, %v273_v30  ;;  %v447_v48 = vld [vmem:[#allocation2 + $0x2] sm:$0xff] }
  0x97   : > { %1206 = vmatpush3.bf16.msra.mxu0 %v1203_v17  ;;  %v590_v30 = vld [vmem:[%s1590_s3 + $0x28] sm:$0xff] }
  0x98   : > { %1208 = vmatprep.subr.bf16.mxu0 %v1207_v29 }
  0x9b   : > { %1210 = vmatpush3.bf16.msra.mxu0 %v1207_v29  ;;  %v261_v36 = vld [vmem:[#allocation2] sm:$0xff]  ;;  %v448_v54 = vld [vmem:[#allocation2 + $0xa] sm:$0xff] }
  0x9c   : > { %1212 = vmatprep.subr.bf16.mxu0 %v1211_v33  ;;  %1100 = vmatprep.mubr.msk.f32.mxu0 %vm284_vm4, %v261_v36  ;;  %v589_v29 = vld [vmem:[%s1590_s3 + $0x20] sm:$0xff] }
  0x9d   : > { %v1259_v31 = vpack.c.bf16 %v590_v30, %v589_v29  ;;  %v593_v36 = vld [vmem:[%s1590_s3 + $0x40] sm:$0xff] }
  0x9f   : > { %1214 = vmatpush3.bf16.msra.mxu0 %v1211_v33  ;;  %v592_v33 = vld [vmem:[%s1590_s3 + $0x38] sm:$0xff] }
  0xa0   : > { %1216 = vmatprep.subr.bf16.mxu0 %v1215_v37  ;;  %v1263_v35 = vpack.c.bf16 %v592_v33, %v591_v32 }
  0xa3   : > { %1218 = vmatpush3.bf16.msra.mxu0 %v1215_v37  ;;  %v979_v37 = vld [vmem:[%s1590_s3 + $0x90] sm:$0xff] }
  0xa4   : > { %1098 = vmatprep.subr.mxu0 %v271_v38 }
  0xa7   : > { %1099 = vmatpush3.msra.mxu0 %v271_v38  ;;  %v980_v38 = vld [vmem:[%s1590_s3 + $0x98] sm:$0xff] }
  0xa8   : > { %1101 = vmatmul.mubr.msk.f32.vlgmr.msra.gmra.mrb[0].mxu0 %vm284_vm4, %v262_v45  ;;  %1220 = vmatprep.subr.bf16.mxu0 %v1219_v43  ;;  %v1267_v41 = vpack.c.bf16 %v980_v38, %v979_v37  ;;  %v984_v45 = vld [vmem:[%s1590_s3 + $0xb8] sm:$0xff] }
  0xa9   : > { %1222 = vmatpush3.bf16.msra.mxu0 %v1219_v43  ;;  %1121 = vmatprep.mubr.msk.f32.mxu0 %vm284_vm4, %v447_v48  ;;  %v985_v48 = vld [vmem:[%s1590_s3 + $0xc0] sm:$0xff] }
  0xaa   : > { %1224 = vmatprep.subr.bf16.mxu0 %v1223_v44 }
  0xad   : > { %1226 = vmatpush3.bf16.msra.mxu0 %v1223_v44  ;;  %v983_v44 = vld [vmem:[%s1590_s3 + $0xb0] sm:$0xff] }
  0xae   : > { %1228 = vmatprep.subr.bf16.mxu0 %v1227_v49  ;;  %v1275_v47 = vpack.c.bf16 %v984_v45, %v983_v44 }
  0xb1   : > { %1230 = vmatpush3.bf16.msra.mxu0 %v1227_v49  ;;  %v986_v49 = vld [vmem:[%s1590_s3 + $0xc8] sm:$0xff] }
  0xb2   : > { %1232 = vmatprep.subr.bf16.mxu0 %v1231_v52  ;;  %v1279_v50 = vpack.c.bf16 %v986_v49, %v985_v48 }
  0xb5   : > { %1234 = vmatpush3.bf16.msra.mxu0 %v1231_v52 }
  0xb6   : > { %1119 = vmatprep.subr.mxu0 %v962_v53 }
  0xb9   : > { %1120 = vmatpush3.msra.mxu0 %v962_v53  ;;  %v990_v53 = vld [vmem:[%s1591_s4] ss:$0 sm:$0xff] }
  0xba   : > { %1122 = vmatmul.mubr.msk.f32.vlgmr.msra.gmra.mrb[0].mxu0 %vm284_vm4, %v448_v54 }
 0x18d   : > { %v1123_v1 = vpop.f32.mrb[0].mxu0 }
 0x18e   : > { %v550_v4 = vadd.f32 %v1123_v1, %v965_v0  ;;  %v531_v5 = vpop.f32.mrb[1].mxu0 }
 0x18f   : > { %v549_v7 = vadd.f32 %v965_v0, %v531_v5 }
 0x190   : > { %v552_v8 = vmax.f32 %v550_v4, 0.0 }
 0x191   : > { %v551_v10 = vmax.f32 %v549_v7, 0.0 }
 0x192   : > { %557 = vrot.lane.b32.xlu1 %v552_v8, %s1311_s16 }
 0x193   : > { %555 = vrot.lane.b32.xlu0 %v551_v10, %s1311_s16 }
 0x196   : > { %565 = vrot.lane.b32.xlu1 %v552_v8, %s1310_s15 }
 0x197   : > { %563 = vrot.lane.b32.xlu0 %v551_v10, %s1310_s15 }
 0x19a   : > { %573 = vrot.lane.b32.xlu1 %v552_v8, %s1312_s25 }
 0x19b   : > { %571 = vrot.lane.b32.xlu0 %v551_v10, %s1312_s25 }
 0x204   : > { %v558_v16 = vpop.permute.xlu1 %557 }
 0x205   : > { %562 = vst.msk [vmem:[#allocation3 + $0x9] sm:$0xff] %vm235_vm0, %v558_v16  ;;  %v556_v17 = vpop.permute.xlu0 %555 }
 0x206   : > { %561 = vst.msk [vmem:[#allocation3 + $0x1] sm:$0xff] %vm235_vm0, %v556_v17 }
 0x208   : > { %v566_v18 = vpop.permute.xlu1 %565 }
 0x209   : > { %570 = vst.msk [vmem:[#allocation3 + $0x9] sm:$0xff] %vm244_vm1, %v566_v18  ;;  %v564_v19 = vpop.permute.xlu0 %563 }
 0x20a   : > { %569 = vst.msk [vmem:[#allocation3 + $0x1] sm:$0xff] %vm244_vm1, %v564_v19 }
 0x20c   : > { %v574_v20 = vpop.permute.xlu1 %573 }
 0x20d   : > { %578 = vst.msk [vmem:[#allocation3 + $0x9] sm:$0xff] %vm253_vm2, %v574_v20  ;;  %v572_v21 = vpop.permute.xlu0 %571 }
 0x20e   : > { %577 = vst.msk [vmem:[#allocation3 + $0x1] sm:$0xff] %vm253_vm2, %v572_v21 }
 0x214   : > { %v581_v24 = vld [vmem:[#allocation3 + $0xf] sm:$0x1] }
 0x215   : > { %582 = vst.msk [vmem:[#allocation3 + $0x11] sm:$0x1] %vm257_vm3, %v581_v24  ;;  %v579_v25 = vld [vmem:[#allocation3 + $0x2] sm:$0x1]  ;;  %v595_v28 = vld [vmem:[#allocation3 + $0x9] sm:$0xff] }
 0x216   : > { %v594_v26 = vld [vmem:[#allocation3 + $0x1] sm:$0xff]  ;;  %580 = vst.msk [vmem:[#allocation3] sm:$0x1] %vm257_vm3, %v579_v25 }
 0x217   : > { %1142 = vmatprep.mubr.msk.f32.mxu1 %vm284_vm4, %v594_v26  ;;  %v584_v43 = vld [vmem:[#allocation3 + $0x8] sm:$0xff] }
 0x218   : > { %1143 = vmatmul.mubr.msk.f32.vlgmr.msra.gmra.mrb[0].mxu1 %vm284_vm4, %v595_v28  ;;  %v768_v46 = vld [vmem:[#allocation3 + $0x2] sm:$0xff] }
 0x219   : > { %1254 = vmatpush3.bf16.msra.mxu1 %v1251_v15 }
 0x21a   : > { %1256 = vmatprep.subr.bf16.mxu1 %v1255_v27 }
 0x21c   : > { %v769_v52 = vld [vmem:[#allocation3 + $0xa] sm:$0xff] }
 0x21d   : > { %1258 = vmatpush3.bf16.msra.mxu1 %v1255_v27  ;;  %v583_v34 = vld [vmem:[#allocation3] sm:$0xff] }
 0x21e   : > { %1260 = vmatprep.subr.bf16.mxu1 %v1259_v31  ;;  %1163 = vmatprep.mubr.msk.f32.mxu1 %vm284_vm4, %v583_v34 }
 0x221   : > { %1262 = vmatpush3.bf16.msra.mxu1 %v1259_v31 }
 0x222   : > { %1264 = vmatprep.subr.bf16.mxu1 %v1263_v35 }
 0x225   : > { %1266 = vmatpush3.bf16.msra.mxu1 %v1263_v35 }
 0x226   : > { %1161 = vmatprep.subr.mxu1 %v593_v36 }
 0x229   : > { %1162 = vmatpush3.msra.mxu1 %v593_v36 }
 0x22a   : > { %1164 = vmatmul.mubr.msk.f32.vlgmr.msra.gmra.mrb[0].mxu1 %vm284_vm4, %v584_v43  ;;  %1268 = vmatprep.subr.bf16.mxu1 %v1267_v41 }
 0x22b   : > { %1270 = vmatpush3.bf16.msra.mxu1 %v1267_v41  ;;  %1184 = vmatprep.mubr.msk.f32.mxu1 %vm284_vm4, %v768_v46 }
 0x22c   : > { %1272 = vmatprep.subr.bf16.mxu1 %v1271_v42 }
 0x22f   : > { %1274 = vmatpush3.bf16.msra.mxu1 %v1271_v42 }
 0x230   : > { %1276 = vmatprep.subr.bf16.mxu1 %v1275_v47 }
 0x233   : > { %1278 = vmatpush3.bf16.msra.mxu1 %v1275_v47 }
 0x234   : > { %1280 = vmatprep.subr.bf16.mxu1 %v1279_v50 }
 0x237   : > { %1282 = vmatpush3.bf16.msra.mxu1 %v1279_v50 }
 0x238   : > { %1182 = vmatprep.subr.mxu1 %v987_v51 }
 0x23b   : > { %1183 = vmatpush3.msra.mxu1 %v987_v51 }
 0x23c   : > { %1185 = vmatmul.mubr.msk.f32.vlgmr.msra.gmra.mrb[0].mxu1 %vm284_vm4, %v769_v52 }
 0x30f   : > { %v1186_v54 = vpop.f32.mrb[0].mxu1 }
 0x310   : > { %v871_v55 = vadd.f32 %v1186_v54, %v990_v53  ;;  %v852_v56 = vpop.f32.mrb[1].mxu1 }
 0x311   : > { %v870_v57 = vadd.f32 %v990_v53, %v852_v56 }
 0x312   : > { %v873_v58 = vadd.f32 %v871_v55, %v1389_v12 }
 0x313   : > { %v872_v59 = vadd.f32 %v870_v57, %v1377_v9 }
 0x314   : > { %876 = vst.msk [vmem:[%s224_s12 + $0x8] sm:$0xff] %vm874_vm5, %v873_v58 }
 0x315   : > { %875 = vst.msk [vmem:[%s224_s12] sm:$0xff] %vm874_vm5, %v872_v59 }
 0x316 PF: > { %s15_s18 = sadd.s32 1, %s1308_s18  }
 0x317   : > { %p12_p4 = scmp.ge.s32.totalorder %s15_s18, 4  }
 0x319   :  { %14 = sbr.rel (!%p12_p4) target bundleno = 1 (0x1), region = 74 }

</bundles_post_ra>
